<compile_context>
chip_gen: v5e
topology: v5e:2x2
jax: 0.10.0
libtpu: 0.0.40
codegen_flags: <defaults>
</compile_context>

<pallas_src>
import functools

import jax
import jax.numpy as jnp
from jax.experimental import pallas as pl
from jax.experimental.pallas import tpu as pltpu


# ----------------------------------------------------------------------------
# DDPM schedules (tiny 1-D precompute; plain JAX glue)
# ----------------------------------------------------------------------------
def linear_beta_schedule(nfe: int) -> jnp.ndarray:
    scale = 1000.0 / nfe
    beta_start = scale * 0.0015
    beta_end = scale * 0.0155
    return jnp.linspace(beta_start, beta_end, nfe, dtype=jnp.float32)


def register_ddpm_schedules(beta_t: jnp.ndarray) -> dict:
    sqrt_beta_t = jnp.sqrt(beta_t)
    alpha_t = 1.0 - beta_t
    log_alpha_t = jnp.log(alpha_t)
    alphabar_t = jnp.exp(jnp.cumsum(log_alpha_t, axis=0))
    sqrtab = jnp.sqrt(alphabar_t)
    oneover_sqrta = 1.0 / jnp.sqrt(alpha_t)
    sqrtmab = jnp.sqrt(1.0 - alphabar_t)
    mab_over_sqrtmab = (1.0 - alpha_t) / sqrtmab
    return {
        "alpha_t": alpha_t,
        "oneover_sqrta": oneover_sqrta,
        "sqrt_beta_t": sqrt_beta_t,
        "alphabar_t": alphabar_t,
        "sqrtab": sqrtab,
        "sqrtmab": sqrtmab,
        "mab_over_sqrtmab": mab_over_sqrtmab,
    }


# ----------------------------------------------------------------------------
# Pallas kernel: fused  noising -> surrogate model -> MSE   (single invocation)
# ----------------------------------------------------------------------------
def ddpm_loss_kernel(
    sab_ref,    # VMEM (R, 1)  f32: sqrtab[t[b]]  replicated per channel row
    smab_ref,   # VMEM (R, 1)  f32: sqrtmab[t[b]] replicated per channel row
    cond_ref,   # VMEM (R, 1)  f32: bias[o] + (t[b]/nfe) * tw[o]   (row = b*C+o)
    wq_ref,     # VMEM (C*C,1) f32: rows [k*C:(k+1)*C] = w_q[k, :] (se_q weights)
    wx_ref,     # VMEM (C*C,1) f32: rows [k*C:(k+1)*C] = w_x[k, :] (x_t weights)
    seq_ref,    # VMEM (R, S)  f32: se_q, lane-dense along S
    dz_ref,     # VMEM (R, S)  f32: d_z
    nz_ref,     # VMEM (R, S)  f32: noise eps ~ N(0,1) (from wrapper)
    loss_ref,   # VMEM (1, 1)  f32: mean squared error (output)
    xt_scr,     # VMEM (R, S)  f32 scratch: x_t
    *,
    B: int,
    C: int,
    inv_total: float,
):
    S = dz_ref.shape[-1]

    # x_t = sqrtab[t]*x0 + sqrtmab[t]*eps  -- one full-width (R, S) VPU pass.
    xt_scr[...] = sab_ref[...] * dz_ref[...] + smab_ref[...] * nz_ref[...]

    sse = jnp.zeros((C, S), jnp.float32)
    for b in range(B):                      # statically unrolled (B is tiny)
        base = b * C
        # pred for all C output channels of this batch at once: (C, S).
        # Start from the timestep-conditioned bias column (C, 1).
        pred = cond_ref[pl.ds(base, C), :]
        for k in range(C):                  # outer-product FMAs over input ch.
            sq_row = seq_ref[pl.ds(base + k, 1), :]      # (1, S)
            xt_row = xt_scr[pl.ds(base + k, 1), :]       # (1, S)
            wq_col = wq_ref[pl.ds(k * C, C), :]          # (C, 1)
            wx_col = wx_ref[pl.ds(k * C, C), :]          # (C, 1)
            pred = pred + wq_col * sq_row + wx_col * xt_row   # (C, S)
        d = xt_scr[pl.ds(base, C), :] - pred
        sse = sse + d * d

    # Single cross-lane/sublane reduction + mean scale + (1, 1) store.
    loss_ref[...] = jnp.reshape(jnp.sum(sse) * inv_total, (1, 1))


# ----------------------------------------------------------------------------
# Wrapper: DDPM.forward(se_q, d_z) -> scalar loss
# ----------------------------------------------------------------------------
def ddpm_forward_loss(se_q, d_z, params, schedules, nfe, key):
    B, C, F_, H, W = d_z.shape
    S = F_ * H * W
    R = B * C

    k_noise, k_t = jax.random.split(key)
    # torch.randint(0, nfe, (B,)) / torch.randn_like(d_z)
    t = jax.random.randint(k_t, (B,), 0, nfe)
    noise = jax.random.normal(k_noise, d_z.shape, dtype=jnp.float32)

    sab_b = schedules["sqrtab"][t].astype(jnp.float32)      # (B,)
    smab_b = schedules["sqrtmab"][t].astype(jnp.float32)    # (B,)
    tfrac_b = t.astype(jnp.float32) / float(nfe)            # (B,)

    # Per-row (R, 1) columns so the kernel's noising is one full-width op.
    sab_col = jnp.repeat(sab_b, C).reshape(R, 1)
    smab_col = jnp.repeat(smab_b, C).reshape(R, 1)

    w, bias, tw = params                                    # (2C, C), (C,), (C,)
    # Timestep-conditioned bias per output row: bias[o] + (t[b]/nfe) * tw[o].
    cond_col = (bias[None, :] + tfrac_b[:, None] * tw[None, :]).reshape(R, 1)
    # Weight columns laid out sublane-contiguously: rows k*C..k*C+C-1 = w[k, :].
    wq_cols = w[:C].reshape(C * C, 1)
    wx_cols = w[C:].reshape(C * C, 1)

    # (B, C, F, H, W) -> (B*C, S): pure reshape, lanes = S (lane-dense).
    se_q2 = se_q.reshape(R, S)
    d_z2 = d_z.reshape(R, S)
    nz2 = noise.reshape(R, S)

    inv_total = 1.0 / float(R * S)
    kernel = functools.partial(ddpm_loss_kernel, B=B, C=C, inv_total=inv_total)

    vmem = pl.BlockSpec(memory_space=pltpu.MemorySpace.VMEM)

    loss = pl.pallas_call(
        kernel,
        out_shape=jax.ShapeDtypeStruct((1, 1), jnp.float32),
        in_specs=[vmem, vmem, vmem, vmem, vmem, vmem, vmem, vmem],
        out_specs=vmem,
        scratch_shapes=[pltpu.VMEM((R, S), jnp.float32)],
    )(sab_col, smab_col, cond_col, wq_cols, wx_cols, se_q2, d_z2, nz2)

    aux = (se_q2, d_z2, nz2, sab_b, smab_b, tfrac_b)
    return loss[0, 0], aux


def reference_loss(aux, params, bcs):
    se_q2, d_z2, nz2, sab_b, smab_b, tfrac_b = aux
    w, bias, tw = params
    B, C, S = bcs
    sq = se_q2.reshape(B, C, S)
    dz = d_z2.reshape(B, C, S)
    nz = nz2.reshape(B, C, S)
    xt = sab_b[:, None, None] * dz + smab_b[:, None, None] * nz
    cat = jnp.concatenate([sq, xt], axis=1)                     # (B, 2C, S)
    pred = (
        jnp.einsum("bks,ko->bos", cat, w)
        + bias[None, :, None]
        + tfrac_b[:, None, None] * tw[None, :, None]
    )
    return jnp.mean((xt - pred) ** 2)


# ----------------------------------------------------------------------------
if __name__ == "__main__":
    B, C, F_, H, W = 2, 4, 4, 8, 8     # small 5-D latents (B, C, F, H, W)
    NFE = 100

    key = jax.random.PRNGKey(0)
    k_se, k_dz, k_w, k_b, k_tw, k_fwd = jax.random.split(key, 6)

    se_q = jax.random.normal(k_se, (B, C, F_, H, W), dtype=jnp.float32)
    d_z = jax.random.normal(k_dz, (B, C, F_, H, W), dtype=jnp.float32)

    # Deterministic surrogate-DiT parameters (2C input channels -> C output).
    w = 0.1 * jax.random.normal(k_w, (2 * C, C), dtype=jnp.float32)
    bias = 0.01 * jax.random.normal(k_b, (C,), dtype=jnp.float32)
    tw = 0.1 * jax.random.normal(k_tw, (C,), dtype=jnp.float32)
    params = (w, bias, tw)

    betas = linear_beta_schedule(NFE)
    schedules = register_ddpm_schedules(betas)

    loss, aux = ddpm_forward_loss(se_q, d_z, params, schedules, NFE, k_fwd)
    loss = jax.block_until_ready(loss)

    ref = jax.block_until_ready(reference_loss(aux, params, (B, C, F_ * H * W)))
    assert jnp.isfinite(loss), "loss is not finite"
    assert jnp.allclose(loss, ref, rtol=1e-3, atol=1e-5), (loss, ref)

    print("KERNEL_OK")
</pallas_src>

<mosaic_0001>
module attributes {stable_mosaic.version = 11 : i64} {
  func.func @ddpm_loss_kernel(%arg0: memref<8x1xf32, #tpu.memory_space<vmem>>, %arg1: memref<8x1xf32, #tpu.memory_space<vmem>>, %arg2: memref<8x1xf32, #tpu.memory_space<vmem>>, %arg3: memref<16x1xf32, #tpu.memory_space<vmem>>, %arg4: memref<16x1xf32, #tpu.memory_space<vmem>>, %arg5: memref<8x256xf32, #tpu.memory_space<vmem>>, %arg6: memref<8x256xf32, #tpu.memory_space<vmem>>, %arg7: memref<8x256xf32, #tpu.memory_space<vmem>>, %arg8: memref<1x1xf32, #tpu.memory_space<vmem>>, %arg9: memref<8x256xf32, #tpu.memory_space<vmem>>) attributes {dimension_semantics = [], scalar_prefetch = 0 : i64, scratch_operands = 1 : i64, tpu.core_type = #tpu.core_type<tc>} {
    %c0 = arith.constant 0 : index
    %c0_0 = arith.constant 0 : index
    %0 = vector.load %arg0[%c0, %c0_0] : memref<8x1xf32, #tpu.memory_space<vmem>>, vector<8x1xf32>
    %c0_1 = arith.constant 0 : index
    %c0_2 = arith.constant 0 : index
    %1 = vector.load %arg6[%c0_1, %c0_2] : memref<8x256xf32, #tpu.memory_space<vmem>>, vector<8x256xf32>
    %2 = vector.broadcast %0 : vector<8x1xf32> to vector<8x256xf32>
    %3 = arith.mulf %2, %1 : vector<8x256xf32>
    %c0_3 = arith.constant 0 : index
    %c0_4 = arith.constant 0 : index
    %4 = vector.load %arg1[%c0_3, %c0_4] : memref<8x1xf32, #tpu.memory_space<vmem>>, vector<8x1xf32>
    %c0_5 = arith.constant 0 : index
    %c0_6 = arith.constant 0 : index
    %5 = vector.load %arg7[%c0_5, %c0_6] : memref<8x256xf32, #tpu.memory_space<vmem>>, vector<8x256xf32>
    %6 = vector.broadcast %4 : vector<8x1xf32> to vector<8x256xf32>
    %7 = arith.mulf %6, %5 : vector<8x256xf32>
    %8 = arith.addf %3, %7 : vector<8x256xf32>
    %c0_7 = arith.constant 0 : index
    %c0_8 = arith.constant 0 : index
    %9 = vector.load %arg9[%c0_7, %c0_8] : memref<8x256xf32, #tpu.memory_space<vmem>>, vector<8x256xf32>
    tpu.vector_store %arg9[%c0_7, %c0_8], %8 {strides = array<i32>} : memref<8x256xf32, #tpu.memory_space<vmem>>, vector<8x256xf32>,
    %cst = arith.constant 0.000000e+00 : f32
    %10 = vector.broadcast %cst : f32 to vector<4x256xf32>
    %c0_9 = arith.constant 0 : index
    %c0_10 = arith.constant 0 : index
    %11 = vector.load %arg2[%c0_9, %c0_10] : memref<8x1xf32, #tpu.memory_space<vmem>>, vector<4x1xf32>
    %c0_11 = arith.constant 0 : index
    %c0_12 = arith.constant 0 : index
    %12 = vector.load %arg5[%c0_11, %c0_12] : memref<8x256xf32, #tpu.memory_space<vmem>>, vector<1x256xf32>
    %c0_13 = arith.constant 0 : index
    %c0_14 = arith.constant 0 : index
    %13 = vector.load %arg9[%c0_13, %c0_14] : memref<8x256xf32, #tpu.memory_space<vmem>>, vector<1x256xf32>
    %c0_15 = arith.constant 0 : index
    %c0_16 = arith.constant 0 : index
    %14 = vector.load %arg3[%c0_15, %c0_16] : memref<16x1xf32, #tpu.memory_space<vmem>>, vector<4x1xf32>
    %c0_17 = arith.constant 0 : index
    %c0_18 = arith.constant 0 : index
    %15 = vector.load %arg4[%c0_17, %c0_18] : memref<16x1xf32, #tpu.memory_space<vmem>>, vector<4x1xf32>
    %16 = vector.broadcast %14 : vector<4x1xf32> to vector<4x256xf32>
    %17 = vector.broadcast %12 : vector<1x256xf32> to vector<4x256xf32>
    %18 = arith.mulf %16, %17 : vector<4x256xf32>
    %19 = vector.broadcast %11 : vector<4x1xf32> to vector<4x256xf32>
    %20 = arith.addf %19, %18 : vector<4x256xf32>
    %21 = vector.broadcast %15 : vector<4x1xf32> to vector<4x256xf32>
    %22 = vector.broadcast %13 : vector<1x256xf32> to vector<4x256xf32>
    %23 = arith.mulf %21, %22 : vector<4x256xf32>
    %24 = arith.addf %20, %23 : vector<4x256xf32>
    %c1 = arith.constant 1 : index
    %c0_19 = arith.constant 0 : index
    %25 = vector.load %arg5[%c1, %c0_19] : memref<8x256xf32, #tpu.memory_space<vmem>>, vector<1x256xf32>
    %c1_20 = arith.constant 1 : index
    %c0_21 = arith.constant 0 : index
    %26 = vector.load %arg9[%c1_20, %c0_21] : memref<8x256xf32, #tpu.memory_space<vmem>>, vector<1x256xf32>
    %c4 = arith.constant 4 : index
    %c0_22 = arith.constant 0 : index
    %27 = vector.load %arg3[%c4, %c0_22] : memref<16x1xf32, #tpu.memory_space<vmem>>, vector<4x1xf32>
    %c4_23 = arith.constant 4 : index
    %c0_24 = arith.constant 0 : index
    %28 = vector.load %arg4[%c4_23, %c0_24] : memref<16x1xf32, #tpu.memory_space<vmem>>, vector<4x1xf32>
    %29 = vector.broadcast %27 : vector<4x1xf32> to vector<4x256xf32>
    %30 = vector.broadcast %25 : vector<1x256xf32> to vector<4x256xf32>
    %31 = arith.mulf %29, %30 : vector<4x256xf32>
    %32 = arith.addf %24, %31 : vector<4x256xf32>
    %33 = vector.broadcast %28 : vector<4x1xf32> to vector<4x256xf32>
    %34 = vector.broadcast %26 : vector<1x256xf32> to vector<4x256xf32>
    %35 = arith.mulf %33, %34 : vector<4x256xf32>
    %36 = arith.addf %32, %35 : vector<4x256xf32>
    %c2 = arith.constant 2 : index
    %c0_25 = arith.constant 0 : index
    %37 = vector.load %arg5[%c2, %c0_25] : memref<8x256xf32, #tpu.memory_space<vmem>>, vector<1x256xf32>
    %c2_26 = arith.constant 2 : index
    %c0_27 = arith.constant 0 : index
    %38 = vector.load %arg9[%c2_26, %c0_27] : memref<8x256xf32, #tpu.memory_space<vmem>>, vector<1x256xf32>
    %c8 = arith.constant 8 : index
    %c0_28 = arith.constant 0 : index
    %39 = vector.load %arg3[%c8, %c0_28] : memref<16x1xf32, #tpu.memory_space<vmem>>, vector<4x1xf32>
    %c8_29 = arith.constant 8 : index
    %c0_30 = arith.constant 0 : index
    %40 = vector.load %arg4[%c8_29, %c0_30] : memref<16x1xf32, #tpu.memory_space<vmem>>, vector<4x1xf32>
    %41 = vector.broadcast %39 : vector<4x1xf32> to vector<4x256xf32>
    %42 = vector.broadcast %37 : vector<1x256xf32> to vector<4x256xf32>
    %43 = arith.mulf %41, %42 : vector<4x256xf32>
    %44 = arith.addf %36, %43 : vector<4x256xf32>
    %45 = vector.broadcast %40 : vector<4x1xf32> to vector<4x256xf32>
    %46 = vector.broadcast %38 : vector<1x256xf32> to vector<4x256xf32>
    %47 = arith.mulf %45, %46 : vector<4x256xf32>
    %48 = arith.addf %44, %47 : vector<4x256xf32>
    %c3 = arith.constant 3 : index
    %c0_31 = arith.constant 0 : index
    %49 = vector.load %arg5[%c3, %c0_31] : memref<8x256xf32, #tpu.memory_space<vmem>>, vector<1x256xf32>
    %c3_32 = arith.constant 3 : index
    %c0_33 = arith.constant 0 : index
    %50 = vector.load %arg9[%c3_32, %c0_33] : memref<8x256xf32, #tpu.memory_space<vmem>>, vector<1x256xf32>
    %c12 = arith.constant 12 : index
    %c0_34 = arith.constant 0 : index
    %51 = vector.load %arg3[%c12, %c0_34] : memref<16x1xf32, #tpu.memory_space<vmem>>, vector<4x1xf32>
    %c12_35 = arith.constant 12 : index
    %c0_36 = arith.constant 0 : index
    %52 = vector.load %arg4[%c12_35, %c0_36] : memref<16x1xf32, #tpu.memory_space<vmem>>, vector<4x1xf32>
    %53 = vector.broadcast %51 : vector<4x1xf32> to vector<4x256xf32>
    %54 = vector.broadcast %49 : vector<1x256xf32> to vector<4x256xf32>
    %55 = arith.mulf %53, %54 : vector<4x256xf32>
    %56 = arith.addf %48, %55 : vector<4x256xf32>
    %57 = vector.broadcast %52 : vector<4x1xf32> to vector<4x256xf32>
    %58 = vector.broadcast %50 : vector<1x256xf32> to vector<4x256xf32>
    %59 = arith.mulf %57, %58 : vector<4x256xf32>
    %60 = arith.addf %56, %59 : vector<4x256xf32>
    %c0_37 = arith.constant 0 : index
    %c0_38 = arith.constant 0 : index
    %61 = vector.load %arg9[%c0_37, %c0_38] : memref<8x256xf32, #tpu.memory_space<vmem>>, vector<4x256xf32>
    %62 = arith.subf %61, %60 : vector<4x256xf32>
    %63 = arith.mulf %62, %62 : vector<4x256xf32>
    %64 = arith.addf %10, %63 : vector<4x256xf32>
    %c4_39 = arith.constant 4 : index
    %c0_40 = arith.constant 0 : index
    %65 = vector.load %arg2[%c4_39, %c0_40] : memref<8x1xf32, #tpu.memory_space<vmem>>, vector<4x1xf32>
    %c4_41 = arith.constant 4 : index
    %c0_42 = arith.constant 0 : index
    %66 = vector.load %arg5[%c4_41, %c0_42] : memref<8x256xf32, #tpu.memory_space<vmem>>, vector<1x256xf32>
    %c4_43 = arith.constant 4 : index
    %c0_44 = arith.constant 0 : index
    %67 = vector.load %arg9[%c4_43, %c0_44] : memref<8x256xf32, #tpu.memory_space<vmem>>, vector<1x256xf32>
    %c0_45 = arith.constant 0 : index
    %c0_46 = arith.constant 0 : index
    %68 = vector.load %arg3[%c0_45, %c0_46] : memref<16x1xf32, #tpu.memory_space<vmem>>, vector<4x1xf32>
    %c0_47 = arith.constant 0 : index
    %c0_48 = arith.constant 0 : index
    %69 = vector.load %arg4[%c0_47, %c0_48] : memref<16x1xf32, #tpu.memory_space<vmem>>, vector<4x1xf32>
    %70 = vector.broadcast %68 : vector<4x1xf32> to vector<4x256xf32>
    %71 = vector.broadcast %66 : vector<1x256xf32> to vector<4x256xf32>
    %72 = arith.mulf %70, %71 : vector<4x256xf32>
    %73 = vector.broadcast %65 : vector<4x1xf32> to vector<4x256xf32>
    %74 = arith.addf %73, %72 : vector<4x256xf32>
    %75 = vector.broadcast %69 : vector<4x1xf32> to vector<4x256xf32>
    %76 = vector.broadcast %67 : vector<1x256xf32> to vector<4x256xf32>
    %77 = arith.mulf %75, %76 : vector<4x256xf32>
    %78 = arith.addf %74, %77 : vector<4x256xf32>
    %c5 = arith.constant 5 : index
    %c0_49 = arith.constant 0 : index
    %79 = vector.load %arg5[%c5, %c0_49] : memref<8x256xf32, #tpu.memory_space<vmem>>, vector<1x256xf32>
    %c5_50 = arith.constant 5 : index
    %c0_51 = arith.constant 0 : index
    %80 = vector.load %arg9[%c5_50, %c0_51] : memref<8x256xf32, #tpu.memory_space<vmem>>, vector<1x256xf32>
    %c4_52 = arith.constant 4 : index
    %c0_53 = arith.constant 0 : index
    %81 = vector.load %arg3[%c4_52, %c0_53] : memref<16x1xf32, #tpu.memory_space<vmem>>, vector<4x1xf32>
    %c4_54 = arith.constant 4 : index
    %c0_55 = arith.constant 0 : index
    %82 = vector.load %arg4[%c4_54, %c0_55] : memref<16x1xf32, #tpu.memory_space<vmem>>, vector<4x1xf32>
    %83 = vector.broadcast %81 : vector<4x1xf32> to vector<4x256xf32>
    %84 = vector.broadcast %79 : vector<1x256xf32> to vector<4x256xf32>
    %85 = arith.mulf %83, %84 : vector<4x256xf32>
    %86 = arith.addf %78, %85 : vector<4x256xf32>
    %87 = vector.broadcast %82 : vector<4x1xf32> to vector<4x256xf32>
    %88 = vector.broadcast %80 : vector<1x256xf32> to vector<4x256xf32>
    %89 = arith.mulf %87, %88 : vector<4x256xf32>
    %90 = arith.addf %86, %89 : vector<4x256xf32>
    %c6 = arith.constant 6 : index
    %c0_56 = arith.constant 0 : index
    %91 = vector.load %arg5[%c6, %c0_56] : memref<8x256xf32, #tpu.memory_space<vmem>>, vector<1x256xf32>
    %c6_57 = arith.constant 6 : index
    %c0_58 = arith.constant 0 : index
    %92 = vector.load %arg9[%c6_57, %c0_58] : memref<8x256xf32, #tpu.memory_space<vmem>>, vector<1x256xf32>
    %c8_59 = arith.constant 8 : index
    %c0_60 = arith.constant 0 : index
    %93 = vector.load %arg3[%c8_59, %c0_60] : memref<16x1xf32, #tpu.memory_space<vmem>>, vector<4x1xf32>
    %c8_61 = arith.constant 8 : index
    %c0_62 = arith.constant 0 : index
    %94 = vector.load %arg4[%c8_61, %c0_62] : memref<16x1xf32, #tpu.memory_space<vmem>>, vector<4x1xf32>
    %95 = vector.broadcast %93 : vector<4x1xf32> to vector<4x256xf32>
    %96 = vector.broadcast %91 : vector<1x256xf32> to vector<4x256xf32>
    %97 = arith.mulf %95, %96 : vector<4x256xf32>
    %98 = arith.addf %90, %97 : vector<4x256xf32>
    %99 = vector.broadcast %94 : vector<4x1xf32> to vector<4x256xf32>
    %100 = vector.broadcast %92 : vector<1x256xf32> to vector<4x256xf32>
    %101 = arith.mulf %99, %100 : vector<4x256xf32>
    %102 = arith.addf %98, %101 : vector<4x256xf32>
    %c7 = arith.constant 7 : index
    %c0_63 = arith.constant 0 : index
    %103 = vector.load %arg5[%c7, %c0_63] : memref<8x256xf32, #tpu.memory_space<vmem>>, vector<1x256xf32>
    %c7_64 = arith.constant 7 : index
    %c0_65 = arith.constant 0 : index
    %104 = vector.load %arg9[%c7_64, %c0_65] : memref<8x256xf32, #tpu.memory_space<vmem>>, vector<1x256xf32>
    %c12_66 = arith.constant 12 : index
    %c0_67 = arith.constant 0 : index
    %105 = vector.load %arg3[%c12_66, %c0_67] : memref<16x1xf32, #tpu.memory_space<vmem>>, vector<4x1xf32>
    %c12_68 = arith.constant 12 : index
    %c0_69 = arith.constant 0 : index
    %106 = vector.load %arg4[%c12_68, %c0_69] : memref<16x1xf32, #tpu.memory_space<vmem>>, vector<4x1xf32>
    %107 = vector.broadcast %105 : vector<4x1xf32> to vector<4x256xf32>
    %108 = vector.broadcast %103 : vector<1x256xf32> to vector<4x256xf32>
    %109 = arith.mulf %107, %108 : vector<4x256xf32>
    %110 = arith.addf %102, %109 : vector<4x256xf32>
    %111 = vector.broadcast %106 : vector<4x1xf32> to vector<4x256xf32>
    %112 = vector.broadcast %104 : vector<1x256xf32> to vector<4x256xf32>
    %113 = arith.mulf %111, %112 : vector<4x256xf32>
    %114 = arith.addf %110, %113 : vector<4x256xf32>
    %c4_70 = arith.constant 4 : index
    %c0_71 = arith.constant 0 : index
    %115 = vector.load %arg9[%c4_70, %c0_71] : memref<8x256xf32, #tpu.memory_space<vmem>>, vector<4x256xf32>
    %116 = arith.subf %115, %114 : vector<4x256xf32>
    %117 = arith.mulf %116, %116 : vector<4x256xf32>
    %118 = arith.addf %64, %117 : vector<4x256xf32>
    %119 = vector.shape_cast %118 : vector<4x256xf32> to vector<1x4x256xf32>
    %cst_72 = arith.constant dense<0.000000e+00> : vector<1xf32>
    %120 = vector.multi_reduction <add>, %119, %cst_72 [1, 2] : vector<1x4x256xf32> to vector<1xf32>
    %121 = vector.shape_cast %120 : vector<1xf32> to vector<1x1x1xf32>
    %122 = vector.extract %121[0, 0, 0] : f32 from vector<1x1x1xf32>
    %cst_73 = arith.constant 4.8828125E-4 : f32
    %123 = arith.mulf %122, %cst_73 : f32
    %124 = vector.broadcast %123 : f32 to vector<1x1xf32>
    %c0_74 = arith.constant 0 : index
    %c0_75 = arith.constant 0 : index
    %125 = vector.load %arg8[%c0_74, %c0_75] : memref<1x1xf32, #tpu.memory_space<vmem>>, vector<1x1xf32>
    tpu.vector_store %arg8[%c0_74, %c0_75], %124 {strides = array<i32>} : memref<1x1xf32, #tpu.memory_space<vmem>>, vector<1x1xf32>,
    return
  }
}

</mosaic_0001>

<bundles_post_ra>
// kernel: tpu_custom_call.1
= control target key start
LH: loop header
LB: loop body
LE: loop exit
PB: predicated region body
PF: predicated region fallthrough
CT: control target
= control target key end

     0   :  { %v389_v2 = vmov 0   ;;  %s537_s0 = inlined_call_operand.vmem [shape: f32[8,1], index: 0, kind: input, shape index: {}]   ;;  %s538_s1 = inlined_call_operand.vmem [shape: f32[8,1], index: 1, kind: input, shape index: {}]   ;;  %s539_s2 = inlined_call_operand.vmem [shape: f32[8,1], index: 2, kind: input, shape index: {}]   ;;  %s540_s3 = inlined_call_operand.vmem [shape: f32[16,1], index: 3, kind: input, shape index: {}]   ;;  %s541_s4 = inlined_call_operand.vmem [shape: f32[16,1], index: 4, kind: input, shape index: {}]   ;;  %s542_s5 = inlined_call_operand.vmem [shape: f32[8,256], index: 5, kind: input, shape index: {}]   ;;  %s543_s6 = inlined_call_operand.vmem [shape: f32[8,256], index: 6, kind: input, shape index: {}]   ;;  %s544_s7 = inlined_call_operand.vmem [shape: f32[8,256], index: 7, kind: input, shape index: {}]   ;;  %s545_s8 = inlined_call_operand.hbm [shape: f32[1,1], index: 8, kind: output, shape index: {}]  }
   0x1   :  { %v57_v0 = vld [vmem:[%s540_s3] sm:$0xf]  ;;  %361 = vset.pattern.permute.xlu1 %v389_v2  ;;  %360 = vset.pattern.permute.xlu0 %v389_v2  ;;  %v202_v3 = vld [vmem:[%s539_s2 + $0x4] sm:$0xf] }
   0x2   :  { %v30_v1 = vld [vmem:[%s537_s0] sm:$0xff]  ;;  %61 = vperm.xlu1 %361, %v57_v0   ;;  %362 = vset.pattern.permute.xlu2 %v389_v2 }
   0x3   :  { %35 = vperm.xlu0 %360, %v30_v1   ;;  %216 = vperm.xlu2 %362, %v202_v3  }
   0x4   :  { %13 = vsyncpa [#allocation4], 0  ;;  %v58_v4 = vld [vmem:[%s541_s4] sm:$0xf]  ;;  %v96_v6 = vld [vmem:[%s540_s3 + $0x4] sm:$0xf] }
   0x5   :  { %v40_v5 = vld [vmem:[%s538_s1] sm:$0xff]  ;;  %v130_v9 = vld [vmem:[%s540_s3 + $0x8] sm:$0xf]  ;;  %v164_v10 = vld [vmem:[%s540_s3 + $0xc] sm:$0xf]  ;;  %vm316_vm0 = vcmask 1043456  }
   0x6   :  { %v97_v7 = vld [vmem:[%s541_s4 + $0x4] sm:$0xf]  ;;  %v54_v8 = vld [vmem:[%s539_s2] sm:$0xf]  ;;  %v131_v11 = vld [vmem:[%s541_s4 + $0x8] sm:$0xf] }
   0x7   :  { %v165_v12 = vld [vmem:[%s541_s4 + $0xc] sm:$0xf]  ;;  %v31_v16 = vld [vmem:[%s543_s6] sm:$0xff]  ;;  %s340_s25 = sshll.u32 %s545_s8, 4  ;;  %vm331_vm1 = vcmask 0   ;;  %s341_s25 = int_to_ptr.hbm [resolvable:$true] %s340_s25 }
   0x8   :  { %v32_v17 = vld [vmem:[%s543_s6 + $0x8] sm:$0xff]  ;;  %v41_v18 = vld [vmem:[%s544_s7] sm:$0xff] }
   0x9   :  { %v42_v19 = vld [vmem:[%s544_s7 + $0x8] sm:$0xff] }
   0xa   :  { %80 = vperm.xlu1 %361, %v58_v4   ;;  %v349_v28 = vld [vmem:[%s542_s5 + $0x1] ss:$8 sm:$0x3]  ;;  %v352_v29 = vld [vmem:[%s542_s5 + $0x4] ss:$8 sm:$0x3] }
   0xb   :  { %45 = vperm.xlu0 %360, %v40_v5   ;;  %100 = vperm.xlu2 %362, %v96_v6   ;;  %v353_v31 = vld [vmem:[%s542_s5 + $0x5] ss:$8 sm:$0x3]  ;;  %v350_v32 = vld [vmem:[%s542_s5 + $0x2] ss:$8 sm:$0x3] }
   0xc   :  { %v104_v33 = vperm.slane %v349_v28, 0  ;;  %v354_v34 = vld [vmem:[%s542_s5 + $0x6] ss:$8 sm:$0x3]  ;;  %v105_v35 = vperm.slane %v349_v28, 1  ;;  %v208_v36 = vperm.slane %v352_v29, 0 }
   0xd   :  { %v209_v37 = vperm.slane %v352_v29, 1  ;;  %v55_v38 = vld [vmem:[%s542_s5] ss:$8 sm:$0x3]  ;;  %v235_v39 = vperm.slane %v353_v31, 0  ;;  %v236_v40 = vperm.slane %v353_v31, 1 }
   0xe   :  { %v138_v41 = vperm.slane %v350_v32, 0  ;;  %v139_v42 = vperm.slane %v350_v32, 1  ;;  %v257_v43 = vperm.slane %v354_v34, 0  ;;  %v505_v44 = vld [vmem:[%s542_s5 + $0x3] ss:$8 sm:$0x3] }
   0xf   :  { %v258_v45 = vperm.slane %v354_v34, 1  ;;  %v65_v46 = vperm.slane %v55_v38, 0  ;;  %v66_v47 = vperm.slane %v55_v38, 1  ;;  %v510_v48 = vld [vmem:[%s542_s5 + $0x7] ss:$8 sm:$0x3] }
  0x10   :  { %v172_v58 = vperm.slane %v505_v44, 0  ;;  %v173_v61 = vperm.slane %v505_v44, 1  ;;  %v279_v62 = vperm.slane %v510_v48, 0  ;;  %v280_v63 = vperm.slane %v510_v48, 1  ;;  %s390_s5 = smov [#allocation3]  }
  0x11   :  { %s338_s22 = sshll.u32 %s390_s5, 4  ;;  %s339_s22 = int_to_ptr.vmem [resolvable:$true] %s338_s22 }
  0x12   :  { %114 = vperm.xlu1 %361, %v97_v7  }
  0x13   :  { %73 = vperm.xlu0 %360, %v54_v8   ;;  %134 = vperm.xlu2 %362, %v130_v9  }
  0x1a   :  { %168 = vperm.xlu1 %361, %v164_v10  }
  0x1b   :  { %148 = vperm.xlu0 %360, %v131_v11   ;;  %182 = vperm.xlu2 %362, %v165_v12  }
  0x5d   :  { %v217_v14 = vpop.permute.xlu2 %216 }
  0x65   :  { %v101_v25 = vpop.permute.xlu2 %100 }
  0x66   :  { %v108_v49 = vmul.f32 %v104_v33, %v101_v25  ;;  %v109_v50 = vmul.f32 %v105_v35, %v101_v25  ;;  %v239_v54 = vmul.f32 %v235_v39, %v101_v25  ;;  %v240_v55 = vmul.f32 %v236_v40, %v101_v25 }
  0x6d   :  { %v135_v53 = vpop.permute.xlu2 %134 }
  0x6e   :  { %v512_v56 = vmul.f32 %v138_v41, %v135_v53  ;;  %v515_v59 = vmul.f32 %v139_v42, %v135_v53  ;;  %v261_v0 = vmul.f32 %v257_v43, %v135_v53  ;;  %v262_v1 = vmul.f32 %v258_v45, %v135_v53 }
  0x74   :  { %v62_v15 = vpop.permute.xlu1 %61 }
  0x75   :  { %v36_v13 = vpop.permute.xlu0 %35  ;;  %v212_v51 = vmul.f32 %v208_v36, %v62_v15  ;;  %v213_v52 = vmul.f32 %v209_v37, %v62_v15  ;;  %v69_v5 = vmul.f32 %v65_v46, %v62_v15  ;;  %v70_v6 = vmul.f32 %v66_v47, %v62_v15 }
  0x76   :  { %v38_v21 = vmul.f32 %v36_v13, %v31_v16  ;;  %v39_v22 = vmul.f32 %v36_v13, %v32_v17 }
  0x77   :  { %v219_v7 = vadd.f32 %v217_v14, %v212_v51  ;;  %v220_v8 = vadd.f32 %v217_v14, %v213_v52 }
  0x7c   :  { %v81_v30 = vpop.permute.xlu1 %80 }
  0x7d   :  { %v46_v20 = vpop.permute.xlu0 %45 }
  0x7e   :  { %v48_v23 = vmul.f32 %v46_v20, %v41_v18  ;;  %v49_v24 = vmul.f32 %v46_v20, %v42_v19 }
  0x80   :  { %v50_v26 = vadd.f32 %v48_v23, %v38_v21  ;;  %v51_v27 = vadd.f32 %v49_v24, %v39_v22 }
  0x82   :  { %52 = vst [vmem:[#allocation2] sm:$0xff] %v50_v26 }
  0x83   :  { %53 = vst [vmem:[#allocation2 + $0x8] sm:$0xff] %v51_v27 }
  0x84   :  { %v115_v2 = vpop.permute.xlu1 %114 }
  0x85   :  { %v74_v57 = vpop.permute.xlu0 %73 }
  0x86   :  { %v76_v17 = vadd.f32 %v74_v57, %v69_v5  ;;  %v77_v18 = vadd.f32 %v74_v57, %v70_v6 }
  0x89   :  { %v296_v44 = vld [vmem:[#allocation2] sm:$0xf0] }
  0x8a   :  { %v206_v60 = vld [vmem:[#allocation2 + $0x4] ss:$8 sm:$0x3]  ;;  %v233_v3 = vld [vmem:[#allocation2 + $0x5] ss:$8 sm:$0x3] }
  0x8b   :  { %v56_v4 = vld [vmem:[#allocation2] ss:$8 sm:$0x3]  ;;  %v95_v9 = vld [vmem:[#allocation2 + $0x1] ss:$8 sm:$0x3] }
  0x8c   :  { %v222_v10 = vperm.slane %v206_v60, 0  ;;  %v223_v11 = vperm.slane %v206_v60, 1  ;;  %v520_v12 = vld [vmem:[#allocation2 + $0x3] ss:$8 sm:$0x3]  ;;  %v84_v13 = vperm.slane %v56_v4, 0  ;;  %v169_v60 = vpop.permute.xlu1 %168 }
  0x8d   :  { %v85_v16 = vperm.slane %v56_v4, 1  ;;  %v277_v19 = vld [vmem:[#allocation2 + $0x7] ss:$8 sm:$0x3]  ;;  %v244_v22 = vperm.slane %v233_v3, 0  ;;  %v245_v23 = vperm.slane %v233_v3, 1  ;;  %v149_v45 = vpop.permute.xlu0 %148 }
  0x8e   :  { %v226_v20 = vmul.f32 %v222_v10, %v81_v30  ;;  %v227_v21 = vmul.f32 %v223_v11, %v81_v30  ;;  %v118_v24 = vperm.slane %v95_v9, 0  ;;  %v119_v25 = vperm.slane %v95_v9, 1  ;;  %v255_v35 = vld [vmem:[#allocation2 + $0x6] ss:$8 sm:$0x3] }
  0x8f   :  { %v88_v26 = vmul.f32 %v84_v13, %v81_v30  ;;  %v89_v15 = vmul.f32 %v85_v16, %v81_v30  ;;  %v186_v14 = vperm.slane %v520_v12, 0  ;;  %v187_v27 = vperm.slane %v520_v12, 1  ;;  %v129_v40 = vld [vmem:[#allocation2 + $0x2] ss:$8 sm:$0x3]  ;;  %v183_v12 = vpop.permute.xlu2 %182 }
  0x90   :  { %v228_v28 = vadd.f32 %v226_v20, %v219_v7  ;;  %v229_v29 = vadd.f32 %v227_v21, %v220_v8  ;;  %v288_v31 = vperm.slane %v277_v19, 0  ;;  %v289_v32 = vperm.slane %v277_v19, 1 }
  0x91   :  { %v90_v33 = vadd.f32 %v88_v26, %v76_v17  ;;  %v91_v34 = vadd.f32 %v89_v15, %v77_v18  ;;  %v248_v38 = vmul.f32 %v244_v22, %v115_v2  ;;  %v249_v39 = vmul.f32 %v245_v23, %v115_v2  ;;  %v195_v26 = vld [vmem:[#allocation2 + $0x8] sm:$0xf] }
  0x92   :  { %v241_v36 = vadd.f32 %v239_v54, %v228_v28  ;;  %v242_v37 = vadd.f32 %v240_v55, %v229_v29  ;;  %v122_v41 = vmul.f32 %v118_v24, %v115_v2  ;;  %v123_v42 = vmul.f32 %v119_v25, %v115_v2  ;;  %v194_v24 = vld [vmem:[#allocation2] sm:$0xf] }
  0x93   :  { %v110_v43 = vadd.f32 %v108_v49, %v90_v33  ;;  %v111_v30 = vadd.f32 %v109_v50, %v91_v34  ;;  %v266_v51 = vperm.slane %v255_v35, 0  ;;  %v267_v52 = vperm.slane %v255_v35, 1 }
  0x94   :  { %v250_v46 = vadd.f32 %v248_v38, %v241_v36  ;;  %v251_v47 = vadd.f32 %v249_v39, %v242_v37  ;;  %v152_v3 = vperm.slane %v129_v40, 0  ;;  %v153_v4 = vperm.slane %v129_v40, 1 }
  0x95   :  { %v124_v53 = vadd.f32 %v122_v41, %v110_v43  ;;  %v125_v57 = vadd.f32 %v123_v42, %v111_v30  ;;  %v270_v55 = vmul.f32 %v266_v51, %v149_v45  ;;  %v271_v6 = vmul.f32 %v267_v52, %v149_v45 }
  0x96   :  { %v263_v5 = vadd.f32 %v261_v0, %v250_v46  ;;  %v264_v54 = vadd.f32 %v262_v1, %v251_v47  ;;  %v156_v49 = vmul.f32 %v152_v3, %v149_v45  ;;  %v157_v50 = vmul.f32 %v153_v4, %v149_v45 }
  0x97   :  { %v144_v7 = vadd.f32 %v512_v56, %v124_v53  ;;  %v145_v2 = vadd.f32 %v515_v59, %v125_v57  ;;  %v283_v8 = vmul.f32 %v279_v62, %v169_v60  ;;  %v284_v9 = vmul.f32 %v280_v63, %v169_v60 }
  0x98   :  { %v272_v10 = vadd.f32 %v270_v55, %v263_v5  ;;  %v273_v11 = vadd.f32 %v271_v6, %v264_v54  ;;  %v176_v0 = vmul.f32 %v172_v58, %v169_v60  ;;  %v177_v1 = vmul.f32 %v173_v61, %v169_v60  ;;  %v297_v61 = vld [vmem:[#allocation2 + $0x8] sm:$0xf0] }
  0x99   :  { %v158_v56 = vadd.f32 %v156_v49, %v144_v7  ;;  %v159_v13 = vadd.f32 %v157_v50, %v145_v2  ;;  %v292_v59 = vmul.f32 %v288_v31, %v183_v12  ;;  %v293_v16 = vmul.f32 %v289_v32, %v183_v12 }
  0x9a   :  { %v285_v17 = vadd.f32 %v283_v8, %v272_v10  ;;  %v286_v18 = vadd.f32 %v284_v9, %v273_v11  ;;  %v190_v19 = vmul.f32 %v186_v14, %v183_v12  ;;  %v191_v62 = vmul.f32 %v187_v27, %v183_v12 }
  0x9b   :  { %v178_v20 = vadd.f32 %v176_v0, %v158_v56  ;;  %v179_v48 = vadd.f32 %v177_v1, %v159_v13 }
  0x9c   :  { %v294_v63 = vadd.f32 %v292_v59, %v285_v17  ;;  %v295_v21 = vadd.f32 %v293_v16, %v286_v18 }
  0x9d   :  { %v192_v22 = vadd.f32 %v190_v19, %v178_v20  ;;  %v193_v23 = vadd.f32 %v191_v62, %v179_v48 }
  0x9e   :  { %v300_v25 = vrot.slane %v294_v63, 4  ;;  %v301_v58 = vrot.slane %v295_v21, 4 }
  0x9f   :  { %v196_v15 = vsub.f32 %v194_v24, %v192_v22  ;;  %v197_v28 = vsub.f32 %v195_v26, %v193_v23 }
  0xa0   :  { %v304_v29 = vsub.f32 %v296_v44, %v300_v25  ;;  %v305_v31 = vsub.f32 %v297_v61, %v301_v58 }
  0xa1   :  { %v198_v14 = vmul.f32 %v196_v15, %v196_v15  ;;  %v199_v27 = vmul.f32 %v197_v28, %v197_v28 }
  0xa2   :  { %v306_v32 = vmul.f32 %v304_v29, %v304_v29  ;;  %v307_v33 = vmul.f32 %v305_v31, %v305_v31 }
  0xa4   :  { %v310_v34 = vrot.slane %v306_v32, 4  ;;  %v311_v35 = vrot.slane %v307_v33, 4 }
  0xa6   :  { %v314_v36 = vadd.f32 %v310_v34, %v198_v14  ;;  %v315_v37 = vadd.f32 %v311_v35, %v199_v27 }
  0xa8   :  { %v317_v38 = vsel %vm316_vm0, %v314_v36, 0.0  ;;  %v318_v39 = vsel %vm316_vm0, %v315_v37, 0.0 }
  0xa9   :  { %v319_v40 = vadd.f32 %v318_v39, %v317_v38 }
  0xab   :  { %320 = vadd.xlane.f32.xlu0 %v319_v40 }
 0x11e   :  { %v321_v41 = vpop.xlane.xlu0 %320 }
 0x11f   :  { %v322_v42 = vrot.slane %v321_v41, 4 }
 0x121   :  { %v323_v43 = vadd.f32 %v322_v42, %v321_v41 }
 0x123   :  { %v324_v30 = vrot.slane %v323_v43, 2 }
 0x125   :  { %v325_v45 = vadd.f32 %v324_v30, %v323_v43 }
 0x127   :  { %v326_v46 = vrot.slane %v325_v45, 1 }
 0x129   :  { %v327_v47 = vadd.f32 %v326_v46, %v325_v45 }
 0x12b   :  { %356 = vpush %v327_v47 }
 0x15c   :  { %s357_s26 = spop %356 }
 0x15d   :  { %s329_s2 = smul.f32 0.00048828125, %s357_s26 }
 0x15f   :  { %v330_v51 = vstv %s329_s2 }
 0x160   :  { %332 = vst.msk [vmem:[#allocation3] sm:$0x1] %vm331_vm1, %v330_v51 }
 0x161   :  { %343 = dma.vmem_to_hbm [thread:$0]  %s339_s22, 16, %s341_s25, [#allocation4]  }
 0x162   :  { %387 = dma.done.wait [#allocation4], 16  }
 0x163   :  { %388 = vsyncadd [#allocation4], 4294967280 }
 0x164   :  { %348 = vsyncpa [#allocation4], 1 }

</bundles_post_ra>
